<compile_context>
chip_gen: v7x
topology: tpu7x:2x2x1
jax: 0.10.0
libtpu: 0.0.40
codegen_flags: <defaults>
</compile_context>

<pallas_src>
import jax
import jax.numpy as jnp
from jax.experimental import pallas as pl
from jax.experimental.pallas import tpu as pltpu


def _round_up(x: int, m: int) -> int:
    return -(-x // m) * m


def _sigmoid_mul_kernel(x_ref, g_ref, o_ref):
    # x_ref: (block_rows, HW)   g_ref: (block_rows, 1)   o_ref: like x_ref
    gate = jax.nn.sigmoid(g_ref[...].astype(jnp.float32)).astype(x_ref.dtype)
    o_ref[...] = x_ref[...] * gate


def _chip_config():
    """Best-effort chip detection -> (has_two_tensorcores, per-step VMEM budget)."""
    try:
        kind = jax.devices()[0].device_kind.lower()
    except Exception:
        kind = ""
    is_v7 = ("v7" in kind) or ("tpu7" in kind) or ("tpu 7" in kind)
    if is_v7:
        return True, 16 << 20    # 2 TCs/chip, 64 MiB VMEM/TC -> smaller blocks
    return False, 32 << 20       # v5e/v6e: 1 TC/chip, 128 MiB VMEM -> bigger blocks


def sigmoid_mul(x_nchw: jax.Array, gate_nc11: jax.Array,
                *, force_pallas: bool = False) -> jax.Array:
    """Returns x_nchw * sigmoid(gate_nc11), broadcasting the gate over (H, W)."""
    n, c, h, w = x_nchw.shape
    assert gate_nc11.shape == (n, c, 1, 1)

    hw = h * w
    rows = n * c
    dsize = jnp.dtype(x_nchw.dtype).itemsize
    gsize = jnp.dtype(gate_nc11.dtype).itemsize
    total_bytes = rows * hw * dsize

    two_tc, vmem_block_budget = _chip_config()

    def _xla_fallback():
        gate = jax.nn.sigmoid(gate_nc11.astype(jnp.float32)).astype(x_nchw.dtype)
        return x_nchw * gate

    # Small tensors: the pallas_call is launch/step-overhead bound; the fused
    # XLA elementwise kernel wins outright.  Higher break-even on v7x HBM.
    xla_threshold = (8 << 20) if two_tc else (4 << 20)
    if not force_pallas and total_bytes < xla_threshold:
        return _xla_fallback()

    x2d = x_nchw.reshape(rows, hw)       # (N*C, HW) -- free view of NCHW
    g2d = gate_nc11.reshape(rows, 1)     # (N*C, 1)

    # --- block sizing by VMEM footprint (lane-padding aware) ------------------
    lanes_pad = _round_up(hw, 128)
    # per block-row VMEM bytes: (in + out) x 2 pipeline buffers, lane-padded
    bytes_per_row = lanes_pad * dsize * 2 * 2
    max_block_rows = max(8, (vmem_block_budget // bytes_per_row) // 8 * 8)
    block_rows = min(_round_up(rows, 8), max_block_rows)

    if two_tc and rows >= 16:
        # Let both v7x TensorCores work on large tensors with an even block count.
        n_blocks = pl.cdiv(rows, block_rows)
        if n_blocks == 1:
            block_rows = _round_up(pl.cdiv(rows, 2), 8)
        elif n_blocks % 2 == 1:
            block_rows = _round_up(pl.cdiv(rows, n_blocks + 1), 8)
    n_blocks = pl.cdiv(rows, block_rows)

    # VMEM footprint of one pipelined step (x in + out, gate in), + headroom.
    block_vmem_bytes = (block_rows * lanes_pad * dsize * 4
                        + block_rows * 128 * gsize * 2)
    if block_vmem_bytes > vmem_block_budget * 2:
        # H*W so large that even an 8-row block overflows the budget.
        # TODO(synk): tile the spatial axis as well for extreme H*W.
        return _xla_fallback()
    vmem_limit = int(max(16 << 20, block_vmem_bytes + (2 << 20)))

    out2d = pl.pallas_call(
        _sigmoid_mul_kernel,
        out_shape=jax.ShapeDtypeStruct((rows, hw), x_nchw.dtype),
        grid_spec=pltpu.PrefetchScalarGridSpec(
            num_scalar_prefetch=0,
            grid=(n_blocks,),
            in_specs=[
                pl.BlockSpec((block_rows, hw), lambda i: (i, 0)),
                pl.BlockSpec((block_rows, 1), lambda i: (i, 0)),
            ],
            out_specs=pl.BlockSpec((block_rows, hw), lambda i: (i, 0)),
        ),
        compiler_params=pltpu.CompilerParams(
            dimension_semantics=("parallel",),
            vmem_limit_bytes=vmem_limit,
        ),
    )(x2d, g2d)

    return out2d.reshape(n, c, h, w)


if __name__ == "__main__":
    key = jax.random.PRNGKey(0)

    def _check(shape, force_pallas):
        n, c, h, w = shape
        k1, k2 = jax.random.split(jax.random.fold_in(key, n * 1000003 + c * 131 + h))
        x = jax.random.normal(k1, (n, c, h, w), dtype=jnp.float32)
        g = jax.random.normal(k2, (n, c, 1, 1), dtype=jnp.float32)
        out = jax.block_until_ready(sigmoid_mul(x, g, force_pallas=force_pallas))
        ref = x * jax.nn.sigmoid(g)
        assert out.shape == shape, shape
        assert jnp.allclose(out, ref, atol=1e-6, rtol=1e-6), shape

    # Pallas path (forced) at shapes consistent with the module's forward.
    _check((1, 128, 7, 7), True)
    _check((3, 100, 7, 7), True)        # rows % 8 != 0 -> ragged last block
    _check((1, 1824, 7, 7), True)       # the module's real shape (x447 / x451)
    # Auto dispatch: small shape takes the fused XLA path, big one takes Pallas.
    _check((1, 1824, 7, 7), False)
    _check((8, 512, 28, 28), False)
    print("KERNEL_OK")
</pallas_src>

<mosaic_0001>
module attributes {stable_mosaic.version = 11 : i64} {
  func.func @_sigmoid_mul_kernel(%arg0: i32, %arg1: memref<128x49xf32, #tpu.memory_space<vmem>>, %arg2: memref<128x1xf32, #tpu.memory_space<vmem>>, %arg3: memref<128x49xf32, #tpu.memory_space<vmem>>) attributes {dimension_semantics = [#tpu.dimension_semantics<parallel>], iteration_bounds = array<i64: 1>, scalar_prefetch = 0 : i64, scratch_operands = 0 : i64, tpu.core_type = #tpu.core_type<tc>, window_params = [{transform_indices = @transform_0, window_bounds = array<i64: 128, 49>}, {transform_indices = @transform_1, window_bounds = array<i64: 128, 1>}, {transform_indices = @transform_2, window_bounds = array<i64: 128, 49>}]} {
    %c0 = arith.constant 0 : index
    %c0_0 = arith.constant 0 : index
    %0 = vector.load %arg2[%c0, %c0_0] : memref<128x1xf32, #tpu.memory_space<vmem>>, vector<128x1xf32>
    %1 = arith.negf %0 : vector<128x1xf32>
    %2 = math.exp %1 : vector<128x1xf32>
    %cst = arith.constant 1.000000e+00 : f32
    %3 = vector.broadcast %cst : f32 to vector<128x1xf32>
    %4 = arith.addf %3, %2 : vector<128x1xf32>
    %5 = arith.divf %3, %4 : vector<128x1xf32>
    %c0_1 = arith.constant 0 : index
    %c0_2 = arith.constant 0 : index
    %6 = vector.load %arg1[%c0_1, %c0_2] : memref<128x49xf32, #tpu.memory_space<vmem>>, vector<128x49xf32>
    %7 = vector.broadcast %5 : vector<128x1xf32> to vector<128x49xf32>
    %8 = arith.mulf %6, %7 : vector<128x49xf32>
    %c0_3 = arith.constant 0 : index
    %c0_4 = arith.constant 0 : index
    %9 = vector.load %arg3[%c0_3, %c0_4] : memref<128x49xf32, #tpu.memory_space<vmem>>, vector<128x49xf32>
    tpu.vector_store %arg3[%c0_3, %c0_4], %8 {strides = array<i32>} : memref<128x49xf32, #tpu.memory_space<vmem>>, vector<128x49xf32>,
    return
  }
  func.func @transform_0(%arg0: i32) -> (i32, i32) {
    %c0_i32 = arith.constant 0 : i32
    %c0_i32_0 = arith.constant 0 : i32
    return %arg0, %c0_i32 : i32, i32
  }
  func.func @transform_1(%arg0: i32) -> (i32, i32) {
    %c0_i32 = arith.constant 0 : i32
    %c0_i32_0 = arith.constant 0 : i32
    return %arg0, %c0_i32 : i32, i32
  }
  func.func @transform_2(%arg0: i32) -> (i32, i32) {
    %c0_i32 = arith.constant 0 : i32
    %c0_i32_0 = arith.constant 0 : i32
    return %arg0, %c0_i32 : i32, i32
  }
}

</mosaic_0001>

<bundles_post_ra>
// kernel: tpu_custom_call.1
= control target key start
LH: loop header
LB: loop body
LE: loop exit
PB: predicated region body
PF: predicated region fallthrough
CT: control target
= control target key end

     0   :  { %v339_v0 = vmov 0   ;;  %vm235_vm0 = vcmask 400384   ;;  %s515_s1 = inlined_call_operand.vmem [shape: f32[128,1], index: 1, kind: input, shape index: {}]   ;;  %s516_s0 = inlined_call_operand.vmem [shape: f32[128,49], index: 0, kind: input, shape index: {}]   ;;  %s517_s2 = inlined_call_operand.vmem [shape: f32[128,49], index: 2, kind: output, shape index: {}]  }
   0x1   :  { %274 = vset.pattern.permute.xlu1 %v339_v0  ;;  %273 = vset.pattern.permute.xlu0 %v339_v0  ;;  %v13_v1 = vld [vmem:[%s515_s1 + $0x10] sm:$0xff]  ;;  %v11_v2 = vld [vmem:[%s515_s1] sm:$0xff]  ;;  %v14_v3 = vld [vmem:[%s515_s1 + $0x18] sm:$0xff] }
   0x2   :  { %v258_v4 = vmul.f32 -1.442695, %v13_v1  ;;  %v256_v5 = vmul.f32 -1.442695, %v11_v2  ;;  %v259_v6 = vmul.f32 -1.442695, %v14_v3 }
   0x3   :  { %v12_v7 = vld [vmem:[%s515_s1 + $0x8] sm:$0xff]  ;;  %v15_v9 = vld [vmem:[%s515_s1 + $0x20] sm:$0xff]  ;;  %v18_v13 = vld [vmem:[%s515_s1 + $0x38] sm:$0xff] }
   0x4   :  { %v16_v8 = vld [vmem:[%s515_s1 + $0x28] sm:$0xff]  ;;  %275 = vpow2.f32 %v258_v4  ;;  %v257_v10 = vmul.f32 -1.442695, %v12_v7  ;;  %v260_v12 = vmul.f32 -1.442695, %v15_v9  ;;  %v17_v14 = vld [vmem:[%s515_s1 + $0x30] sm:$0xff] }
   0x5   :  { %v261_v11 = vmul.f32 -1.442695, %v16_v8  ;;  %277 = vpow2.f32 %v256_v5  ;;  %v20_v15 = vld [vmem:[%s515_s1 + $0x48] sm:$0xff]  ;;  %v263_v16 = vmul.f32 -1.442695, %v18_v13  ;;  %v19_v18 = vld [vmem:[%s515_s1 + $0x40] sm:$0xff] }
   0x6   :  { %279 = vpow2.f32 %v259_v6  ;;  %v262_v17 = vmul.f32 -1.442695, %v17_v14  ;;  %v265_v19 = vmul.f32 -1.442695, %v20_v15  ;;  %v22_v20 = vld [vmem:[%s515_s1 + $0x58] sm:$0xff]  ;;  %v21_v22 = vld [vmem:[%s515_s1 + $0x50] sm:$0xff] }
   0x7   :  { %281 = vpow2.f32 %v257_v10  ;;  %v264_v21 = vmul.f32 -1.442695, %v19_v18  ;;  %v267_v23 = vmul.f32 -1.442695, %v22_v20  ;;  %v266_v24 = vmul.f32 -1.442695, %v21_v22 }
   0x8   :  { %283 = vpow2.f32 %v261_v11  ;;  %v24_v28 = vld [vmem:[%s515_s1 + $0x68] sm:$0xff]  ;;  %v23_v45 = vld [vmem:[%s515_s1 + $0x60] sm:$0xff]  ;;  %v26_v47 = vld [vmem:[%s515_s1 + $0x78] sm:$0xff] }
   0x9   :  { %285 = vpow2.f32 %v260_v12  ;;  %v269_v35 = vmul.f32 -1.442695, %v24_v28  ;;  %v25_v50 = vld [vmem:[%s515_s1 + $0x70] sm:$0xff]  ;;  %v268_v52 = vmul.f32 -1.442695, %v23_v45  ;;  %v123_v18 = vld [vmem:[%s516_s0] sm:$0xff] }
   0xa   :  { %287 = vpow2.f32 %v263_v16  ;;  %v271_v54 = vmul.f32 -1.442695, %v26_v47  ;;  %v270_v56 = vmul.f32 -1.442695, %v25_v50  ;;  %v134_v47 = vld [vmem:[%s516_s0 + $0x58] sm:$0xff] }
   0xb   :  { %289 = vpow2.f32 %v262_v17  ;;  %v125_v17 = vld [vmem:[%s516_s0 + $0x10] sm:$0xff] }
   0xc   :  { %291 = vpow2.f32 %v265_v19 }
   0xd   :  { %293 = vpow2.f32 %v264_v21 }
   0xe   :  { %v276_v25 = vpop.eup %275  ;;  %295 = vpow2.f32 %v267_v23  ;;  %v126_v23 = vld [vmem:[%s516_s0 + $0x18] sm:$0xff] }
   0xf   :  { %v278_v26 = vpop.eup %277  ;;  %v77_v27 = vadd.f32 1.0, %v276_v25  ;;  %297 = vpow2.f32 %v266_v24  ;;  %v124_v24 = vld [vmem:[%s516_s0 + $0x8] sm:$0xff] }
  0x10   :  { %v280_v29 = vpop.eup %279  ;;  %v75_v30 = vadd.f32 1.0, %v278_v26 }
  0x11   :  { %v282_v31 = vpop.eup %281  ;;  %299 = vrcp.f32 %v77_v27  ;;  %v78_v32 = vadd.f32 1.0, %v280_v29  ;;  %v128_v29 = vld [vmem:[%s516_s0 + $0x28] sm:$0xff] }
  0x12   :  { %v284_v33 = vpop.eup %283  ;;  %301 = vrcp.f32 %v75_v30  ;;  %v76_v34 = vadd.f32 1.0, %v282_v31  ;;  %v127_v30 = vld [vmem:[%s516_s0 + $0x20] sm:$0xff] }
  0x13   :  { %v286_v36 = vpop.eup %285  ;;  %303 = vrcp.f32 %v78_v32  ;;  %v80_v37 = vadd.f32 1.0, %v284_v33 }
  0x14   :  { %v288_v38 = vpop.eup %287  ;;  %305 = vrcp.f32 %v76_v34  ;;  %v79_v39 = vadd.f32 1.0, %v286_v36  ;;  %v129_v36 = vld [vmem:[%s516_s0 + $0x30] sm:$0xff] }
  0x15   :  { %v290_v40 = vpop.eup %289  ;;  %v82_v42 = vadd.f32 1.0, %v288_v38  ;;  %307 = vpow2.f32 %v269_v35  ;;  %v130_v35 = vld [vmem:[%s516_s0 + $0x38] sm:$0xff] }
  0x16   :  { %v292_v41 = vpop.eup %291  ;;  %309 = vrcp.f32 %v80_v37  ;;  %v81_v44 = vadd.f32 1.0, %v290_v40 }
  0x17   :  { %v294_v43 = vpop.eup %293  ;;  %311 = vrcp.f32 %v79_v39  ;;  %v84_v46 = vadd.f32 1.0, %v292_v41  ;;  %v132_v41 = vld [vmem:[%s516_s0 + $0x48] sm:$0xff] }
  0x18   :  { %v296_v48 = vpop.eup %295  ;;  %v83_v49 = vadd.f32 1.0, %v294_v43  ;;  %313 = vrcp.f32 %v82_v42  ;;  %v131_v42 = vld [vmem:[%s516_s0 + $0x40] sm:$0xff] }
  0x19   :  { %v298_v51 = vpop.eup %297  ;;  %315 = vrcp.f32 %v81_v44  ;;  %v86_v59 = vadd.f32 1.0, %v296_v48  ;;  %v133_v48 = vld [vmem:[%s516_s0 + $0x50] sm:$0xff] }
  0x1a   :  { %317 = vrcp.f32 %v84_v46  ;;  %v85_v61 = vadd.f32 1.0, %v298_v51 }
  0x1b   :  { %v300_v53 = vpop.eup %299  ;;  %319 = vrcp.f32 %v83_v49 }
  0x1c   :  { %v302_v55 = vpop.eup %301  ;;  %151 = vperm.xlu1 %274, %v300_v53   ;;  %321 = vpow2.f32 %v268_v52  ;;  %v136_v53 = vld [vmem:[%s516_s0 + $0x68] sm:$0xff] }
  0x1d   :  { %v304_v57 = vpop.eup %303  ;;  %141 = vperm.xlu0 %273, %v302_v55   ;;  %323 = vpow2.f32 %v271_v54  ;;  %v135_v55 = vld [vmem:[%s516_s0 + $0x60] sm:$0xff] }
  0x1e   :  { %v306_v58 = vpop.eup %305  ;;  %325 = vpow2.f32 %v270_v56 }
  0x1f   :  { %v308_v60 = vpop.eup %307  ;;  %327 = vrcp.f32 %v86_v59 }
  0x20   :  { %156 = vperm.xlu1 %274, %v304_v57   ;;  %v310_v62 = vpop.eup %309  ;;  %v88_v0 = vadd.f32 1.0, %v308_v60  ;;  %329 = vrcp.f32 %v85_v61  ;;  %v137_v61 = vld [vmem:[%s516_s0 + $0x70] sm:$0xff] }
  0x21   :  { %146 = vperm.xlu0 %273, %v306_v58   ;;  %v312_v63 = vpop.eup %311  ;;  %v138_v58 = vld [vmem:[%s516_s0 + $0x78] sm:$0xff] }
  0x22   :  { %v314_v1 = vpop.eup %313  ;;  %331 = vrcp.f32 %v88_v0 }
  0x23   :  { %v316_v2 = vpop.eup %315 }
  0x24   :  { %166 = vperm.xlu1 %274, %v310_v62   ;;  %v318_v3 = vpop.eup %317 }
  0x25   :  { %161 = vperm.xlu0 %273, %v312_v63   ;;  %v320_v4 = vpop.eup %319 }
  0x26   :  { %v322_v5 = vpop.eup %321 }
  0x27   :  { %v324_v6 = vpop.eup %323  ;;  %v87_v7 = vadd.f32 1.0, %v322_v5 }
  0x28   :  { %176 = vperm.xlu1 %274, %v314_v1   ;;  %v326_v8 = vpop.eup %325  ;;  %v90_v9 = vadd.f32 1.0, %v324_v6 }
  0x29   :  { %171 = vperm.xlu0 %273, %v316_v2   ;;  %333 = vrcp.f32 %v87_v7  ;;  %v89_v10 = vadd.f32 1.0, %v326_v8  ;;  %v328_v11 = vpop.eup %327 }
  0x2a   :  { %335 = vrcp.f32 %v90_v9  ;;  %v330_v12 = vpop.eup %329 }
  0x2b   :  { %337 = vrcp.f32 %v89_v10 }
  0x2c   :  { %186 = vperm.xlu1 %274, %v318_v3   ;;  %v332_v13 = vpop.eup %331 }
  0x2d   :  { %181 = vperm.xlu0 %273, %v320_v4  }
  0x30   :  { %196 = vperm.xlu1 %274, %v328_v11  }
  0x31   :  { %191 = vperm.xlu0 %273, %v330_v12  }
  0x33   :  { %v334_v14 = vpop.eup %333 }
  0x34   :  { %206 = vperm.xlu1 %274, %v332_v13   ;;  %v336_v15 = vpop.eup %335 }
  0x35   :  { %201 = vperm.xlu0 %273, %v334_v14   ;;  %v338_v16 = vpop.eup %337 }
  0x38   :  { %216 = vperm.xlu1 %274, %v336_v15  }
  0x39   :  { %211 = vperm.xlu0 %273, %v338_v16  }
  0x9b   :  { %v152_v19 = vpop.permute.xlu1 %151 }
  0x9c   :  { %v221_v20 = vmul.f32 %v152_v19, %v125_v17  ;;  %v142_v21 = vpop.permute.xlu0 %141 }
  0x9d   :  { %v219_v22 = vmul.f32 %v142_v21, %v123_v18 }
  0x9e   :  { %238 = vst.msk [vmem:[%s517_s2 + $0x10] sm:$0xff] %vm235_vm0, %v221_v20 }
  0x9f   :  { %236 = vst.msk [vmem:[%s517_s2] sm:$0xff] %vm235_vm0, %v219_v22  ;;  %v157_v25 = vpop.permute.xlu1 %156 }
  0xa0   :  { %v222_v26 = vmul.f32 %v157_v25, %v126_v23  ;;  %v147_v27 = vpop.permute.xlu0 %146 }
  0xa1   :  { %v220_v28 = vmul.f32 %v147_v27, %v124_v24 }
  0xa2   :  { %239 = vst.msk [vmem:[%s517_s2 + $0x18] sm:$0xff] %vm235_vm0, %v222_v26 }
  0xa3   :  { %237 = vst.msk [vmem:[%s517_s2 + $0x8] sm:$0xff] %vm235_vm0, %v220_v28  ;;  %v167_v31 = vpop.permute.xlu1 %166 }
  0xa4   :  { %v224_v32 = vmul.f32 %v167_v31, %v128_v29  ;;  %v162_v33 = vpop.permute.xlu0 %161 }
  0xa5   :  { %v223_v34 = vmul.f32 %v162_v33, %v127_v30 }
  0xa6   :  { %241 = vst.msk [vmem:[%s517_s2 + $0x28] sm:$0xff] %vm235_vm0, %v224_v32 }
  0xa7   :  { %240 = vst.msk [vmem:[%s517_s2 + $0x20] sm:$0xff] %vm235_vm0, %v223_v34  ;;  %v177_v37 = vpop.permute.xlu1 %176 }
  0xa8   :  { %v226_v38 = vmul.f32 %v177_v37, %v130_v35  ;;  %v172_v39 = vpop.permute.xlu0 %171 }
  0xa9   :  { %v225_v40 = vmul.f32 %v172_v39, %v129_v36 }
  0xaa   :  { %243 = vst.msk [vmem:[%s517_s2 + $0x38] sm:$0xff] %vm235_vm0, %v226_v38 }
  0xab   :  { %242 = vst.msk [vmem:[%s517_s2 + $0x30] sm:$0xff] %vm235_vm0, %v225_v40  ;;  %v187_v43 = vpop.permute.xlu1 %186 }
  0xac   :  { %v228_v44 = vmul.f32 %v187_v43, %v132_v41  ;;  %v182_v45 = vpop.permute.xlu0 %181 }
  0xad   :  { %v227_v46 = vmul.f32 %v182_v45, %v131_v42 }
  0xae   :  { %245 = vst.msk [vmem:[%s517_s2 + $0x48] sm:$0xff] %vm235_vm0, %v228_v44 }
  0xaf   :  { %244 = vst.msk [vmem:[%s517_s2 + $0x40] sm:$0xff] %vm235_vm0, %v227_v46  ;;  %v197_v49 = vpop.permute.xlu1 %196 }
  0xb0   :  { %v230_v50 = vmul.f32 %v197_v49, %v134_v47  ;;  %v192_v51 = vpop.permute.xlu0 %191 }
  0xb1   :  { %v229_v52 = vmul.f32 %v192_v51, %v133_v48 }
  0xb2   :  { %247 = vst.msk [vmem:[%s517_s2 + $0x58] sm:$0xff] %vm235_vm0, %v230_v50 }
  0xb3   :  { %246 = vst.msk [vmem:[%s517_s2 + $0x50] sm:$0xff] %vm235_vm0, %v229_v52  ;;  %v207_v54 = vpop.permute.xlu1 %206 }
  0xb4   :  { %v232_v56 = vmul.f32 %v207_v54, %v136_v53  ;;  %v202_v57 = vpop.permute.xlu0 %201 }
  0xb5   :  { %v231_v59 = vmul.f32 %v202_v57, %v135_v55 }
  0xb6   :  { %249 = vst.msk [vmem:[%s517_s2 + $0x68] sm:$0xff] %vm235_vm0, %v232_v56 }
  0xb7   :  { %v217_v60 = vpop.permute.xlu1 %216  ;;  %248 = vst.msk [vmem:[%s517_s2 + $0x60] sm:$0xff] %vm235_vm0, %v231_v59 }
  0xb8   :  { %v234_v62 = vmul.f32 %v217_v60, %v138_v58  ;;  %v212_v63 = vpop.permute.xlu0 %211 }
  0xb9   :  { %v233_v0 = vmul.f32 %v212_v63, %v137_v61 }
  0xba   :  { %251 = vst.msk [vmem:[%s517_s2 + $0x78] sm:$0xff] %vm235_vm0, %v234_v62 }
  0xbb   :  { %250 = vst.msk [vmem:[%s517_s2 + $0x70] sm:$0xff] %vm235_vm0, %v233_v0 }

</bundles_post_ra>
